<compile_context>
chip_gen: v6e
topology: v6e:2x2x1
jax: 0.10.0
libtpu: 0.0.40
codegen_flags: <defaults>
</compile_context>

<pallas_src>
import jax
import jax.numpy as jnp
from jax.experimental import pallas as pl
from jax.experimental.pallas import tpu as pltpu


OUT_LANES = 128  # lane-dense output slab width (multiple of 128)


# ---------------------------------------------------------------------------
# Kernel: 4 fused matmuls, output written directly as a [TILE_B, 128] slab
# whose first two lanes are cat([q1, q2], 1).
# ---------------------------------------------------------------------------
def critic_kernel(x_ref,
                  w1_ref, b1_ref,
                  w2_ref, b2_ref,
                  w3_ref, b3_ref,      # packed [w31 | w32]  (bf16)
                  wq_ref, bq_ref,      # block-diagonal Q head, 128 lanes
                  out_ref):
    bf16 = jnp.bfloat16

    # fc1 -> relu   (bf16 operands, f32 accumulate; bias/ReLU in f32)
    h = jnp.dot(x_ref[...].astype(bf16), w1_ref[...],
                preferred_element_type=jnp.float32) + b1_ref[...]
    h = jnp.maximum(h, 0.0)

    # fc2 -> relu
    h = jnp.dot(h.astype(bf16), w2_ref[...],
                preferred_element_type=jnp.float32) + b2_ref[...]
    h = jnp.maximum(h, 0.0)

    # fused fc3_1 | fc3_2 -> relu   (cols 0:h3 = branch 1, h3:2h3 = branch 2)
    h = jnp.dot(h.astype(bf16), w3_ref[...],
                preferred_element_type=jnp.float32) + b3_ref[...]
    h = jnp.maximum(h, 0.0)

    # block-diagonal Q head: lane 0 = q1, lane 1 = q2, lanes 2..127 = 0.
    out_ref[...] = (jnp.dot(h.astype(bf16), wq_ref[...],
                            preferred_element_type=jnp.float32)
                    + bq_ref[...])


# ---------------------------------------------------------------------------
# Host-side weight packing (done once, outside the kernel).
# ---------------------------------------------------------------------------
def pack_params(params):
    w1, b1 = params["fc1"]
    w2, b2 = params["fc2"]
    w31, b31 = params["fc3_1"]
    w32, b32 = params["fc3_2"]
    wq1, bq1 = params["Q1"]
    wq2, bq2 = params["Q2"]

    h3 = w31.shape[1]

    # Fuse the two branch layers along the output axis.
    w3 = jnp.concatenate([w31, w32], axis=1)             # [h2, 2*h3]
    b3 = jnp.concatenate([b31, b32], axis=1)             # [1, 2*h3]

    # Block-diagonal, lane-padded Q head:
    #   lane 0 <- Q1 (rows 0:h3), lane 1 <- Q2 (rows h3:2h3), lanes 2..127 = 0.
    wq = jnp.zeros((2 * h3, OUT_LANES), jnp.float32)
    wq = wq.at[:h3, 0:1].set(wq1)
    wq = wq.at[h3:, 1:2].set(wq2)
    bq = jnp.zeros((1, OUT_LANES), jnp.float32)
    bq = bq.at[:, 0:1].set(bq1)
    bq = bq.at[:, 1:2].set(bq2)

    bf16 = jnp.bfloat16
    # Weights stored bf16 (MXU operands); biases stay f32 (VPU adds).
    return (w1.astype(bf16), b1,
            w2.astype(bf16), b2,
            w3.astype(bf16), b3,
            wq.astype(bf16), bq)


# ---------------------------------------------------------------------------
# Tile-size heuristic.
# ---------------------------------------------------------------------------
def _round_up(x, m):
    return ((x + m - 1) // m) * m


def _choose_tile_b(B, *, max_tile=1024, granule=8):
    """Pick the batch tile.

    * tiny B: one tile rounded up to the 8-row sublane granule (activations
      are f32 in VMEM, so the granule is 8).
    * otherwise: ~ceil(B/2) so the grid has >=2 steps (v7x megacore gets both
      TensorCores busy), capped at 1024 rows (measured ~85% of roofline for
      tiny-layer tiled kernels; VMEM cost is trivial).
    """
    b_rounded = _round_up(B, granule)
    if b_rounded <= 2 * granule:
        return b_rounded
    return min(max_tile, _round_up(pl.cdiv(b_rounded, 2), granule))


# ---------------------------------------------------------------------------
# Wrapper: batch-parallel grid, weights VMEM-resident, no host-side padding.
# ---------------------------------------------------------------------------
def critic_forward(x, packed, *, tile_b=None):
    """x: [B, input_size] float32.  packed: output of pack_params()."""
    w1, b1, w2, b2, w3, b3, wq, bq = packed
    B, d_in = x.shape

    if tile_b is None:
        tile_b = _choose_tile_b(B)

    grid = (pl.cdiv(B, tile_b),)   # ragged last block is masked by Pallas

    def _resident(arr):
        # Full-array block + constant index_map -> stays in VMEM across steps.
        return pl.BlockSpec(arr.shape, lambda i: (0, 0))

    out = pl.pallas_call(
        critic_kernel,
        out_shape=jax.ShapeDtypeStruct((B, OUT_LANES), jnp.float32),
        grid=grid,
        in_specs=[
            pl.BlockSpec((tile_b, d_in), lambda i: (i, 0)),   # x: tiled batch
            _resident(w1), _resident(b1),
            _resident(w2), _resident(b2),
            _resident(w3), _resident(b3),
            _resident(wq), _resident(bq),
        ],
        out_specs=pl.BlockSpec((tile_b, OUT_LANES), lambda i: (i, 0)),
        compiler_params=pltpu.CompilerParams(
            dimension_semantics=("parallel",)),
    )(x, w1, b1, w2, b2, w3, b3, wq, bq)

    # Lanes 2..127 are zero padding; only the first two lanes are q1|q2.
    return out[:, :2]


# ---------------------------------------------------------------------------
# Parameter construction (matches PyTorch inits) + pure-JAX references.
# ---------------------------------------------------------------------------
def xavier_uniform(key, fan_in, fan_out):
    bound = jnp.sqrt(6.0 / (fan_in + fan_out))
    # Stored as [in, out] (transposed vs PyTorch's [out, in]); xavier bound is
    # symmetric in fan_in/fan_out so the distribution matches.
    return jax.random.uniform(key, (fan_in, fan_out), jnp.float32, -bound, bound)


def bias_init(key, fan_in, fan_out):
    # PyTorch nn.Linear default bias init: U(-1/sqrt(fan_in), 1/sqrt(fan_in))
    bound = 1.0 / jnp.sqrt(jnp.float32(fan_in))
    return jax.random.uniform(key, (1, fan_out), jnp.float32, -bound, bound)


def make_params(key, layer_dims):
    """layer_dims: {'l1': (in, h1), 'l2': (h1, h2), 'l3': (h2, h3), 'l4': (h3, 1)}"""
    params = {}
    names_dims = [
        ("fc1", layer_dims["l1"]),
        ("fc2", layer_dims["l2"]),
        ("fc3_1", layer_dims["l3"]),
        ("fc3_2", layer_dims["l3"]),
        ("Q1", (layer_dims["l4"][0], 1)),
        ("Q2", (layer_dims["l4"][0], 1)),
    ]
    keys = jax.random.split(key, 2 * len(names_dims))
    for i, (name, (fin, fout)) in enumerate(names_dims):
        w = xavier_uniform(keys[2 * i], fin, fout)
        b = bias_init(keys[2 * i + 1], fin, fout)
        params[name] = (w, b)
    return params


def critic_reference(x, params):
    """Pure-f32 reference (PyTorch semantics)."""
    def lin(h, name):
        w, b = params[name]
        return h @ w + b
    h = jax.nn.relu(lin(x, "fc1"))
    h = jax.nn.relu(lin(h, "fc2"))
    q1 = lin(jax.nn.relu(lin(h, "fc3_1")), "Q1")
    q2 = lin(jax.nn.relu(lin(h, "fc3_2")), "Q2")
    return jnp.concatenate([q1, q2], axis=1)


def critic_reference_bf16(x, params):
    """Reference mimicking the kernel's math: bf16 dot operands, f32 accumulate."""
    bf16 = jnp.bfloat16
    def lin(h, name):
        w, b = params[name]
        return jnp.dot(h.astype(bf16), w.astype(bf16),
                       preferred_element_type=jnp.float32) + b
    h = jax.nn.relu(lin(x, "fc1"))
    h = jax.nn.relu(lin(h, "fc2"))
    q1 = lin(jax.nn.relu(lin(h, "fc3_1")), "Q1")
    q2 = lin(jax.nn.relu(lin(h, "fc3_2")), "Q2")
    return jnp.concatenate([q1, q2], axis=1)


if __name__ == "__main__":
    # Small, forward-consistent shapes (state_action dim = 32).
    layer_dims = {"l1": (32, 64), "l2": (64, 64), "l3": (64, 32), "l4": (32, 1)}

    key = jax.random.PRNGKey(0)
    k_x, k_p = jax.random.split(key)
    params = make_params(k_p, layer_dims)
    packed = pack_params(params)     # one-time host-side packing

    # B=8 : single exact tile.  B=40 : two grid steps incl. a masked ragged
    # tail (exercises the no-pad path and the >=2-step v7x heuristic).
    for B in (8, 40):
        x = jax.random.normal(jax.random.fold_in(k_x, B),
                              (B, layer_dims["l1"][0]), jnp.float32)

        out = critic_forward(x, packed)
        out = jax.block_until_ready(out)

        ref_bf16 = critic_reference_bf16(x, params)   # same math as the kernel
        ref_f32 = critic_reference(x, params)          # PyTorch f32 semantics

        assert out.shape == (B, 2), out.shape
        assert jnp.allclose(out, ref_bf16, atol=5e-3, rtol=5e-3), (
            "bf16-path mismatch", jnp.max(jnp.abs(out - ref_bf16)))
        assert jnp.allclose(out, ref_f32, atol=5e-2, rtol=5e-2), (
            "f32-reference mismatch", jnp.max(jnp.abs(out - ref_f32)))

    print("KERNEL_OK")
</pallas_src>

<mosaic_0001>
module attributes {stable_mosaic.version = 11 : i64} {
  func.func @critic_kernel(%arg0: i32, %arg1: memref<8x32xf32, #tpu.memory_space<vmem>>, %arg2: memref<32x64xbf16, #tpu.memory_space<vmem>>, %arg3: memref<1x64xf32, #tpu.memory_space<vmem>>, %arg4: memref<64x64xbf16, #tpu.memory_space<vmem>>, %arg5: memref<1x64xf32, #tpu.memory_space<vmem>>, %arg6: memref<64x64xbf16, #tpu.memory_space<vmem>>, %arg7: memref<1x64xf32, #tpu.memory_space<vmem>>, %arg8: memref<64x128xbf16, #tpu.memory_space<vmem>>, %arg9: memref<1x128xf32, #tpu.memory_space<vmem>>, %arg10: memref<8x128xf32, #tpu.memory_space<vmem>>) attributes {dimension_semantics = [#tpu.dimension_semantics<parallel>], iteration_bounds = array<i64: 1>, scalar_prefetch = 0 : i64, scratch_operands = 0 : i64, tpu.core_type = #tpu.core_type<tc>, window_params = [{transform_indices = @transform_0, window_bounds = array<i64: 8, 32>}, {pipeline_mode = #tpu.pipeline_mode<synchronous>, transform_indices = @transform_1, window_bounds = array<i64: 32, 64>}, {pipeline_mode = #tpu.pipeline_mode<synchronous>, transform_indices = @transform_2, window_bounds = array<i64: 1, 64>}, {pipeline_mode = #tpu.pipeline_mode<synchronous>, transform_indices = @transform_3, window_bounds = array<i64: 64, 64>}, {pipeline_mode = #tpu.pipeline_mode<synchronous>, transform_indices = @transform_4, window_bounds = array<i64: 1, 64>}, {pipeline_mode = #tpu.pipeline_mode<synchronous>, transform_indices = @transform_5, window_bounds = array<i64: 64, 64>}, {pipeline_mode = #tpu.pipeline_mode<synchronous>, transform_indices = @transform_6, window_bounds = array<i64: 1, 64>}, {pipeline_mode = #tpu.pipeline_mode<synchronous>, transform_indices = @transform_7, window_bounds = array<i64: 64, 128>}, {pipeline_mode = #tpu.pipeline_mode<synchronous>, transform_indices = @transform_8, window_bounds = array<i64: 1, 128>}, {transform_indices = @transform_9, window_bounds = array<i64: 8, 128>}]} {
    %c0 = arith.constant 0 : index
    %c0_0 = arith.constant 0 : index
    %0 = vector.load %arg1[%c0, %c0_0] : memref<8x32xf32, #tpu.memory_space<vmem>>, vector<8x32xf32>
    %1 = arith.truncf %0 : vector<8x32xf32> to vector<8x32xbf16>
    %c0_1 = arith.constant 0 : index
    %c0_2 = arith.constant 0 : index
    %2 = vector.load %arg2[%c0_1, %c0_2] : memref<32x64xbf16, #tpu.memory_space<vmem>>, vector<32x64xbf16>
    %cst = arith.constant dense<0.000000e+00> : vector<8x64xf32>
    %3 = tpu.matmul %1, %2, %cst {dimension_numbers = #tpu.dot_dimension_numbers<[1], [0], [0], [1], [0, 0, 1, 1], [], []>} : vector<8x32xbf16>, vector<32x64xbf16>, vector<8x64xf32> -> vector<8x64xf32>
    %c0_3 = arith.constant 0 : index
    %c0_4 = arith.constant 0 : index
    %4 = vector.load %arg3[%c0_3, %c0_4] : memref<1x64xf32, #tpu.memory_space<vmem>>, vector<1x64xf32>
    %5 = vector.broadcast %4 : vector<1x64xf32> to vector<8x64xf32>
    %6 = arith.addf %3, %5 : vector<8x64xf32>
    %cst_5 = arith.constant 0.000000e+00 : f32
    %7 = vector.broadcast %cst_5 : f32 to vector<8x64xf32>
    %8 = arith.maximumf %6, %7 : vector<8x64xf32>
    %9 = arith.truncf %8 : vector<8x64xf32> to vector<8x64xbf16>
    %c0_6 = arith.constant 0 : index
    %c0_7 = arith.constant 0 : index
    %10 = vector.load %arg4[%c0_6, %c0_7] : memref<64x64xbf16, #tpu.memory_space<vmem>>, vector<64x64xbf16>
    %cst_8 = arith.constant dense<0.000000e+00> : vector<8x64xf32>
    %11 = tpu.matmul %9, %10, %cst_8 {dimension_numbers = #tpu.dot_dimension_numbers<[1], [0], [0], [1], [0, 0, 1, 1], [], []>} : vector<8x64xbf16>, vector<64x64xbf16>, vector<8x64xf32> -> vector<8x64xf32>
    %c0_9 = arith.constant 0 : index
    %c0_10 = arith.constant 0 : index
    %12 = vector.load %arg5[%c0_9, %c0_10] : memref<1x64xf32, #tpu.memory_space<vmem>>, vector<1x64xf32>
    %13 = vector.broadcast %12 : vector<1x64xf32> to vector<8x64xf32>
    %14 = arith.addf %11, %13 : vector<8x64xf32>
    %cst_11 = arith.constant 0.000000e+00 : f32
    %15 = vector.broadcast %cst_11 : f32 to vector<8x64xf32>
    %16 = arith.maximumf %14, %15 : vector<8x64xf32>
    %17 = arith.truncf %16 : vector<8x64xf32> to vector<8x64xbf16>
    %c0_12 = arith.constant 0 : index
    %c0_13 = arith.constant 0 : index
    %18 = vector.load %arg6[%c0_12, %c0_13] : memref<64x64xbf16, #tpu.memory_space<vmem>>, vector<64x64xbf16>
    %cst_14 = arith.constant dense<0.000000e+00> : vector<8x64xf32>
    %19 = tpu.matmul %17, %18, %cst_14 {dimension_numbers = #tpu.dot_dimension_numbers<[1], [0], [0], [1], [0, 0, 1, 1], [], []>} : vector<8x64xbf16>, vector<64x64xbf16>, vector<8x64xf32> -> vector<8x64xf32>
    %c0_15 = arith.constant 0 : index
    %c0_16 = arith.constant 0 : index
    %20 = vector.load %arg7[%c0_15, %c0_16] : memref<1x64xf32, #tpu.memory_space<vmem>>, vector<1x64xf32>
    %21 = vector.broadcast %20 : vector<1x64xf32> to vector<8x64xf32>
    %22 = arith.addf %19, %21 : vector<8x64xf32>
    %cst_17 = arith.constant 0.000000e+00 : f32
    %23 = vector.broadcast %cst_17 : f32 to vector<8x64xf32>
    %24 = arith.maximumf %22, %23 : vector<8x64xf32>
    %25 = arith.truncf %24 : vector<8x64xf32> to vector<8x64xbf16>
    %c0_18 = arith.constant 0 : index
    %c0_19 = arith.constant 0 : index
    %26 = vector.load %arg8[%c0_18, %c0_19] : memref<64x128xbf16, #tpu.memory_space<vmem>>, vector<64x128xbf16>
    %cst_20 = arith.constant dense<0.000000e+00> : vector<8x128xf32>
    %27 = tpu.matmul %25, %26, %cst_20 {dimension_numbers = #tpu.dot_dimension_numbers<[1], [0], [0], [1], [0, 0, 1, 1], [], []>} : vector<8x64xbf16>, vector<64x128xbf16>, vector<8x128xf32> -> vector<8x128xf32>
    %c0_21 = arith.constant 0 : index
    %c0_22 = arith.constant 0 : index
    %28 = vector.load %arg9[%c0_21, %c0_22] : memref<1x128xf32, #tpu.memory_space<vmem>>, vector<1x128xf32>
    %29 = vector.broadcast %28 : vector<1x128xf32> to vector<8x128xf32>
    %30 = arith.addf %27, %29 : vector<8x128xf32>
    %c0_23 = arith.constant 0 : index
    %c0_24 = arith.constant 0 : index
    %31 = vector.load %arg10[%c0_23, %c0_24] : memref<8x128xf32, #tpu.memory_space<vmem>>, vector<8x128xf32>
    tpu.vector_store %arg10[%c0_23, %c0_24], %30 {strides = array<i32>} : memref<8x128xf32, #tpu.memory_space<vmem>>, vector<8x128xf32>,
    return
  }
  func.func @transform_0(%arg0: i32) -> (i32, i32) {
    %c0_i32 = arith.constant 0 : i32
    %c0_i32_0 = arith.constant 0 : i32
    return %arg0, %c0_i32 : i32, i32
  }
  func.func @transform_1(%arg0: i32) -> (i32, i32) {
    %c0_i32 = arith.constant 0 : i32
    %c0_i32_0 = arith.constant 0 : i32
    %c0_i32_1 = arith.constant 0 : i32
    return %c0_i32, %c0_i32_0 : i32, i32
  }
  func.func @transform_2(%arg0: i32) -> (i32, i32) {
    %c0_i32 = arith.constant 0 : i32
    %c0_i32_0 = arith.constant 0 : i32
    %c0_i32_1 = arith.constant 0 : i32
    return %c0_i32, %c0_i32_0 : i32, i32
  }
  func.func @transform_3(%arg0: i32) -> (i32, i32) {
    %c0_i32 = arith.constant 0 : i32
    %c0_i32_0 = arith.constant 0 : i32
    %c0_i32_1 = arith.constant 0 : i32
    return %c0_i32, %c0_i32_0 : i32, i32
  }
  func.func @transform_4(%arg0: i32) -> (i32, i32) {
    %c0_i32 = arith.constant 0 : i32
    %c0_i32_0 = arith.constant 0 : i32
    %c0_i32_1 = arith.constant 0 : i32
    return %c0_i32, %c0_i32_0 : i32, i32
  }
  func.func @transform_5(%arg0: i32) -> (i32, i32) {
    %c0_i32 = arith.constant 0 : i32
    %c0_i32_0 = arith.constant 0 : i32
    %c0_i32_1 = arith.constant 0 : i32
    return %c0_i32, %c0_i32_0 : i32, i32
  }
  func.func @transform_6(%arg0: i32) -> (i32, i32) {
    %c0_i32 = arith.constant 0 : i32
    %c0_i32_0 = arith.constant 0 : i32
    %c0_i32_1 = arith.constant 0 : i32
    return %c0_i32, %c0_i32_0 : i32, i32
  }
  func.func @transform_7(%arg0: i32) -> (i32, i32) {
    %c0_i32 = arith.constant 0 : i32
    %c0_i32_0 = arith.constant 0 : i32
    %c0_i32_1 = arith.constant 0 : i32
    return %c0_i32, %c0_i32_0 : i32, i32
  }
  func.func @transform_8(%arg0: i32) -> (i32, i32) {
    %c0_i32 = arith.constant 0 : i32
    %c0_i32_0 = arith.constant 0 : i32
    %c0_i32_1 = arith.constant 0 : i32
    return %c0_i32, %c0_i32_0 : i32, i32
  }
  func.func @transform_9(%arg0: i32) -> (i32, i32) {
    %c0_i32 = arith.constant 0 : i32
    %c0_i32_0 = arith.constant 0 : i32
    return %arg0, %c0_i32 : i32, i32
  }
}

</mosaic_0001>

<bundles_post_ra>
// kernel: tpu_custom_call.1
= control target key start
LH: loop header
LB: loop body
LE: loop exit
PB: predicated region body
PF: predicated region fallthrough
CT: control target
= control target key end

     0   :  { %14 = vsyncpa [#allocation3], 0  ;;  %s803_s0 = inlined_call_operand.hbm [shape: f32[8,32], index: 0, kind: input, shape index: {}]   ;;  %s804_s1 = inlined_call_operand.hbm [shape: bf16[32,64], index: 1, kind: input, shape index: {}]   ;;  %s805_s2 = inlined_call_operand.vmem [shape: f32[1,64], index: 2, kind: input, shape index: {}]   ;;  %s806_s3 = inlined_call_operand.hbm [shape: bf16[64,64], index: 3, kind: input, shape index: {}]   ;;  %s807_s4 = inlined_call_operand.vmem [shape: f32[1,64], index: 4, kind: input, shape index: {}]   ;;  %s808_s5 = inlined_call_operand.hbm [shape: bf16[64,64], index: 5, kind: input, shape index: {}]   ;;  %s809_s6 = inlined_call_operand.vmem [shape: f32[1,64], index: 6, kind: input, shape index: {}]   ;;  %s810_s7 = inlined_call_operand.hbm [shape: bf16[64,128], index: 7, kind: input, shape index: {}]   ;;  %s811_s8 = inlined_call_operand.vmem [shape: f32[1,128], index: 8, kind: input, shape index: {}]   ;;  %s812_s9 = inlined_call_operand.hbm [shape: f32[8,128], index: 9, kind: output, shape index: {}]  }
   0x1   :  { %15 = vsyncpa [#allocation6], 0 }
   0x2   :  { %16 = vsyncpa [#allocation9], 0 }
   0x3   :  { %17 = vsyncpa [#allocation4], 0  ;;  %s676_s30 = smov [#allocation5]  }
   0x4   :  { %s33_s10 = sshll.u32 %s676_s30, 4  ;;  %s34_s10 = int_to_ptr.vmem [resolvable:$true] %s33_s10 }
   0x5   :  { %s556_s11 = scalar_lea.vmem %s34_s10, 256  ;;  %p561_p1 = scmp.lt.s32.totalorder %s34_s10, %s34_s10 }
   0x6   :  { %p557_p0 = scmp.ne.s32.totalorder %s34_s10, %s556_s11  ;;  %p562_p2 = scmp.lt.s32.totalorder %s556_s11, %s556_s11 }
   0x8   :  { %p563_p3 = por %p562_p2, %p561_p1 }
   0xa   :  { %p564_p4 = pnand %p563_p3, %p557_p0 }
   0xc   :  { %567 = shalt.err (!%p564_p4)
}
   0xd   :  { %s677_s12 = smov 64   ;;  %s678_s13 = smov 4  }
   0xe   :  { %39 = dma.hbm_to_vmem [thread:$0]  %s804_s1, 256, %s34_s10, [#allocation6], %s677_s12, %s677_s12, %s678_s13  }
   0xf   :  { %s679_s16 = smov [#allocation8]   ;;  %s680_s18 = smov [#allocation2]  }
  0x10   :  { %s61_s17 = sshll.u32 %s679_s16, 4  ;;  %s24_s19 = sshll.u32 %s680_s18, 4  ;;  %s62_s17 = int_to_ptr.vmem [resolvable:$true] %s61_s17  ;;  %s25_s19 = int_to_ptr.vmem [resolvable:$true] %s24_s19 }
  0x11   :  { %s576_s20 = scalar_lea.vmem %s62_s17, 512  ;;  %p581_p6 = scmp.lt.s32.totalorder %s62_s17, %s62_s17 }
  0x12   :  { %p577_p5 = scmp.ne.s32.totalorder %s62_s17, %s576_s20  ;;  %p582_p7 = scmp.lt.s32.totalorder %s576_s20, %s576_s20 }
  0x14   :  { %p583_p8 = por %p582_p7, %p581_p6 }
  0x16   :  { %p584_p9 = pnand %p583_p8, %p577_p5 }
  0x18   :  { %587 = shalt.err (!%p584_p9)
}
  0x19   :  { %67 = dma.hbm_to_vmem [thread:$0]  %s808_s5, 512, %s62_s17, [#allocation9], %s677_s12, %s677_s12, %s678_s13  }
  0x1a   :  { %s596_s1 = scalar_lea.vmem %s25_s19, 128  ;;  %p601_p11 = scmp.lt.s32.totalorder %s25_s19, %s25_s19 }
  0x1b   :  { %p597_p10 = scmp.ne.s32.totalorder %s25_s19, %s596_s1  ;;  %p602_p12 = scmp.lt.s32.totalorder %s596_s1, %s596_s1 }
  0x1d   :  { %p603_p13 = por %p602_p12, %p601_p11 }
  0x1f   :  { %p604_p0 = pnand %p603_p13, %p597_p10 }
  0x21   :  { %607 = shalt.err (!%p604_p0)
}
  0x22   :  { %27 = dma.hbm_to_vmem [thread:$0]  %s803_s0, 128, %s25_s19, [#allocation3]  }
  0x23   :  { %s681_s25 = smov [#allocation7]   ;;  %s682_s27 = smov [#allocation10]  }
  0x24   :  { %s47_s26 = sshll.u32 %s681_s25, 4  ;;  %s75_s28 = sshll.u32 %s682_s27, 4  ;;  %s48_s26 = int_to_ptr.vmem [resolvable:$true] %s47_s26  ;;  %s76_s28 = int_to_ptr.vmem [resolvable:$true] %s75_s28 }
  0x25   :  { %s616_s29 = scalar_lea.vmem %s48_s26, 512  ;;  %p621_p2 = scmp.lt.s32.totalorder %s48_s26, %s48_s26 }
  0x26   :  { %p617_p1 = scmp.ne.s32.totalorder %s48_s26, %s616_s29  ;;  %p622_p3 = scmp.lt.s32.totalorder %s616_s29, %s616_s29 }
  0x28   :  { %p623_p4 = por %p622_p3, %p621_p2 }
  0x2a   :  { %p624_p5 = pnand %p623_p4, %p617_p1 }
  0x2c   :  { %627 = shalt.err (!%p624_p5)
}
  0x2d   :  { %53 = dma.hbm_to_vmem [thread:$0]  %s806_s3, 512, %s48_s26, [#allocation6], %s677_s12, %s677_s12, %s678_s13  }
  0x2e   :  { %s636_s0 = scalar_lea.vmem %s76_s28, 512  ;;  %p641_p7 = scmp.lt.s32.totalorder %s76_s28, %s76_s28 }
  0x2f   :  { %p637_p6 = scmp.ne.s32.totalorder %s76_s28, %s636_s0  ;;  %p642_p8 = scmp.lt.s32.totalorder %s636_s0, %s636_s0 }
  0x31   :  { %p643_p9 = por %p642_p8, %p641_p7 }
  0x33   :  { %p644_p10 = pnand %p643_p9, %p637_p6 }
  0x35   :  { %647 = shalt.err (!%p644_p10)
}
  0x36   :  { %81 = dma.hbm_to_vmem [thread:$0]  %s810_s7, 512, %s76_s28, [#allocation9], %s677_s12, %s677_s12, %s678_s13  }
  0x37   :  { %668 = dma.done.wait [#allocation3], 128  }
  0x38   :  { %669 = vsyncadd [#allocation3], 4294967168 }
  0x39   :  { %670 = dma.done.wait [#allocation6], 768  }
  0x3a   :  { %671 = vsyncadd [#allocation6], 4294966528 }
  0x3b   :  { %672 = dma.done.wait [#allocation9], 1024  }
  0x3c   :  { %673 = vsyncadd [#allocation9], 4294966272  ;;  %v683_v0 = vmov 0.0   ;;  %vm684_vm0 = vmmov 0   ;;  %v534_v1 = vld [vmem:[#allocation5 + $0x8] sm:$0xff]   ;;  %v535_v2 = vld [vmem:[#allocation5] sm:$0xff]  }
  0x3d   :  { %480 = vmatprep.subr.bf16.mxu0 %v683_v0  ;;  %484 = vmatprep.mubr.msk.bf16.mxu0 %vm684_vm0, %v683_v0  ;;  %v100_v3 = vld [vmem:[#allocation2] sm:$0xff]  ;;  %v536_v4 = vld [vmem:[#allocation7 + $0x18] sm:$0xff]   ;;  %vm125_vm1 = vcmask 261120   ;;  %v537_v5 = vld [vmem:[#allocation7 + $0x10] sm:$0xff]   ;;  %vm210_vm2 = vcmask 523264   ;;  %s685_s16 = smov [#allocation11]  }
  0x3e   :  { %488 = vmatprep.subr.bf16.mxu1 %v683_v0  ;;  %496 = vmatprep.mubr.msk.bf16.mxu1 %vm684_vm0, %v683_v0  ;;  %v101_v6 = vpack.c.bf16 %v100_v3, %v100_v3  ;;  %v538_v7 = vld [vmem:[#allocation7 + $0x8] sm:$0xff]   ;;  %v539_v8 = vld [vmem:[#allocation7] sm:$0xff]   ;;  %v540_v9 = vld [vmem:[#allocation8 + $0x18] sm:$0xff]   ;;  %s429_s17 = sshll.u32 %s685_s16, 4  ;;  %s430_s17 = int_to_ptr.vmem [resolvable:$true] %s429_s17 }
  0x3f   :  { %481 = vmatpush3.bf16.msra.mxu0 %v534_v1  ;;  %489 = vmatpush3.bf16.msra.mxu1 %v536_v4  ;;  %v541_v10 = vld [vmem:[#allocation8 + $0x10] sm:$0xff]   ;;  %v440_v11 = vld [vmem:[%s805_s2] ss:$0 sm:$0xff]  ;;  %v543_v20 = vld [vmem:[#allocation8] sm:$0xff]   ;;  %p653_p12 = scmp.lt.s32.totalorder %s430_s17, %s430_s17 }
  0x40   :  { %482 = vmatprep.subr.bf16.mxu0 %v683_v0  ;;  %490 = vmatprep.subr.bf16.mxu1 %v683_v0  ;;  %v542_v19 = vld [vmem:[#allocation8 + $0x8] sm:$0xff]   ;;  %v544_v21 = vld [vmem:[#allocation10 + $0x18] sm:$0xff]   ;;  %v545_v22 = vld [vmem:[#allocation10 + $0x10] sm:$0xff]  }
  0x41   :  { %v444_v23 = vld [vmem:[%s807_s4] ss:$0 sm:$0xff]  ;;  %v547_v32 = vld [vmem:[#allocation10] sm:$0xff]  }
  0x42   :  { %v546_v31 = vld [vmem:[#allocation10 + $0x8] sm:$0xff]  }
  0x43   :  { %483 = vmatpush3.bf16.msra.mxu0 %v535_v2  ;;  %491 = vmatpush3.bf16.msra.mxu1 %v537_v5  ;;  %v450_v33 = vld [vmem:[%s809_s6] ss:$0 sm:$0xff]  ;;  %s648_s6 = scalar_lea.vmem %s430_s17, 128 }
  0x44   :  { %500 = vmatprep.subr.bf16.mxu0 %v683_v0  ;;  %492 = vmatprep.subr.bf16.mxu1 %v683_v0  ;;  %v456_v41 = vld [vmem:[%s811_s8] ss:$0 sm:$0xff]  ;;  %p649_p11 = scmp.ne.s32.totalorder %s430_s17, %s648_s6  ;;  %p654_p13 = scmp.lt.s32.totalorder %s648_s6, %s648_s6 }
  0x46   :  { %485 = vmatmul.mubr.msk.bf16.vlgmr.msra.gmra.mxu0 %vm125_vm1, %v101_v6  ;;  %p655_p0 = por %p654_p13, %p653_p12 }
  0x47   :  { %508 = vmatprep.mubr.msk.bf16.mxu0 %vm684_vm0, %v683_v0  ;;  %493 = vmatpush3.bf16.msra.mxu1 %v538_v7 }
  0x48   :  { %494 = vmatprep.subr.bf16.mxu1 %v683_v0  ;;  %501 = vmatpush3.bf16.msra.mxu0 %v540_v9  ;;  %p656_p1 = pnand %p655_p0, %p649_p11 }
  0x49   :  { %502 = vmatprep.subr.bf16.mxu0 %v683_v0 }
  0x4b   :  { %495 = vmatpush3.bf16.msra.mxu1 %v539_v8 }
  0x4c   :  { %512 = vmatprep.subr.bf16.mxu1 %v683_v0  ;;  %503 = vmatpush3.bf16.msra.mxu0 %v541_v10 }
  0x4d   :  { %504 = vmatprep.subr.bf16.mxu0 %v683_v0 }
  0x50   :  { %505 = vmatpush3.bf16.msra.mxu0 %v542_v19 }
  0x51   :  { %506 = vmatprep.subr.bf16.mxu0 %v683_v0 }
  0x54   :  { %507 = vmatpush3.bf16.msra.mxu0 %v543_v20 }
 0x106   :  { %v163_v12 = vpop.f32.mrf.mxu0 }
 0x107   :  { %v164_v13 = vadd.f32 %v440_v11, %v163_v12 }
 0x108   :  { %v486_v14 = vpop.f32.mrf.mxu0 }
 0x109   :  { %v169_v15 = vmax.f32 %v164_v13, 0.0 }
 0x10a   :  { %v166_v16 = vpop.f32.mrf.mxu0 }
 0x10b   :  { %v170_v17 = vpack.c.bf16 %v169_v15, %v169_v15 }
 0x10c   :  { %v487_v18 = vpop.f32.mrf.mxu0 }
 0x10d   :  { %497 = vmatmul.mubr.msk.bf16.vlgmr.msra.gmra.mxu1 %vm210_vm2, %v170_v17 }
 0x10e   :  { %520 = vmatprep.mubr.msk.bf16.mxu1 %vm684_vm0, %v683_v0  ;;  %513 = vmatpush3.bf16.msra.mxu1 %v544_v21 }
 0x10f   :  { %514 = vmatprep.subr.bf16.mxu1 %v683_v0 }
 0x112   :  { %515 = vmatpush3.bf16.msra.mxu1 %v545_v22 }
 0x113   :  { %516 = vmatprep.subr.bf16.mxu1 %v683_v0 }
 0x116   :  { %517 = vmatpush3.bf16.msra.mxu1 %v546_v31 }
 0x117   :  { %518 = vmatprep.subr.bf16.mxu1 %v683_v0 }
 0x11a   :  { %519 = vmatpush3.bf16.msra.mxu1 %v547_v32 }
 0x1cd   :  { %v248_v24 = vpop.f32.mrf.mxu1 }
 0x1ce   :  { %v249_v25 = vadd.f32 %v444_v23, %v248_v24 }
 0x1cf   :  { %v498_v26 = vpop.f32.mrf.mxu1 }
 0x1d0   :  { %v254_v27 = vmax.f32 %v249_v25, 0.0 }
 0x1d1   :  { %v251_v28 = vpop.f32.mrf.mxu1 }
 0x1d2   :  { %v255_v29 = vpack.c.bf16 %v254_v27, %v254_v27 }
 0x1d3   :  { %v499_v30 = vpop.f32.mrf.mxu1 }
 0x1d4   :  { %509 = vmatmul.mubr.msk.bf16.vlgmr.msra.gmra.mxu0 %vm210_vm2, %v255_v29 }
 0x294   :  { %v332_v34 = vpop.f32.mrf.mxu0 }
 0x295   :  { %v333_v35 = vadd.f32 %v450_v33, %v332_v34 }
 0x296   :  { %v510_v36 = vpop.f32.mrf.mxu0 }
 0x297   :  { %v338_v37 = vmax.f32 %v333_v35, 0.0 }
 0x298   :  { %v335_v38 = vpop.f32.mrf.mxu0 }
 0x299   :  { %v339_v39 = vpack.c.bf16 %v338_v37, %v338_v37 }
 0x29a   :  { %v511_v40 = vpop.f32.mrf.mxu0 }
 0x29b   :  { %521 = vmatmul.mubr.msk.bf16.vlgmr.msra.gmra.mxu1 %vm210_vm2, %v339_v39 }
 0x35b   :  { %v416_v42 = vpop.f32.mrf.mxu1 }
 0x35c   :  { %v417_v43 = vadd.f32 %v456_v41, %v416_v42 }
 0x35d   :  { %v522_v44 = vpop.f32.mrf.mxu1 }
 0x35e   :  { %422 = vst [vmem:[#allocation11] sm:$0xff] %v417_v43 }
 0x35f   :  { %v419_v45 = vpop.f32.mrf.mxu1 }
 0x360   :  { %659 = shalt.err (!%p656_p1)
}
 0x361   :  { %432 = dma.vmem_to_hbm [thread:$0]  %s430_s17, 128, %s812_s9, [#allocation4]   ;;  %v523_v46 = vpop.f32.mrf.mxu1 }
 0x362   :  { %674 = dma.done.wait [#allocation4], 128  }
 0x363   :  { %675 = vsyncadd [#allocation4], 4294967168 }
 0x364   :  { %436 = vsyncpa [#allocation3], 1 }
 0x365   :  { %437 = vsyncpa [#allocation6], 1 }
 0x366   :  { %438 = vsyncpa [#allocation9], 1 }
 0x367   :  { %439 = vsyncpa [#allocation4], 1 }

</bundles_post_ra>
